<compile_context>
chip_gen: v7x
topology: tpu7x:2x2x1
jax: 0.10.0
libtpu: 0.0.40
codegen_flags: <defaults>
</compile_context>

<pallas_src>
import jax
import jax.numpy as jnp
import numpy as np
from jax import lax
from jax.experimental import pallas as pl
from jax.experimental.pallas import tpu as pltpu

# ----------------------------- model dims -----------------------------------
B = 2        # batch
S = 8        # sequence length
D = 32       # token feature dim == transformer model dim == transformer.output_dim
H = 4        # attention heads
DH = D // H
F = 64       # feed-forward hidden dim
O = 5        # output-module ("head") label dim
PAD = 128    # lane-dense output slab width (repr in [0:D], head logits in [D:D+O])

# --------------------- packed parameter-slab row layout ----------------------
R_WQKV = 0            # (D, 3D)  fused QKV projection (Q columns pre-scaled)
R_WO   = R_WQKV + D   # (D, D)   attention output projection
R_W1   = R_WO + D     # (D, F)   FFN up
R_W2   = R_W1 + D     # (F, D)   FFN down
R_WOUT = R_W2 + F     # (D, PAD) fused output: [ I_D | w_head | 0 ]
R_BQKV = R_WOUT + D   # row 192: (1, 3D)
R_BO   = R_BQKV + 1   # row 193: (1, D)
R_B1   = R_BO + 1     # row 194: (1, F)
R_B2   = R_B1 + 1     # row 195: (1, D)
R_LN1G = R_B2 + 1     # row 196: (1, D)
R_LN1B = R_LN1G + 1   # row 197
R_LN2G = R_LN1B + 1   # row 198
R_LN2B = R_LN2G + 1   # row 199
R_BOUT = R_LN2B + 1   # row 200: (1, PAD)
R_POS  = 208          # rows 208:216 : (S, D) sinusoidal positional encoding
P_ROWS = 216          # total rows (multiple of 8)


# ------------------------------ the kernel ----------------------------------
def _layer_norm(x, gamma, beta, eps=1e-5):
    mu = jnp.mean(x, axis=-1, keepdims=True)
    var = jnp.mean((x - mu) ** 2, axis=-1, keepdims=True)
    return (x - mu) * lax.rsqrt(var + eps) * gamma + beta


def transformer_kernel(
    # scalar prefetch
    lengths_ref,          # SMEM (B,) int32
    # inputs (VMEM, whole arrays)
    x_ref,                # (B, S, D) token representations
    p_ref,                # (P_ROWS, PAD) packed parameter slab (single DMA)
    # output
    out_ref,              # (B, S, PAD) lane-dense slab
):
    # ---- static slices out of the single packed parameter slab --------------
    wqkv = p_ref[R_WQKV:R_WQKV + D, 0:3 * D]      # (D, 3D), Q cols pre-scaled
    wo   = p_ref[R_WO:R_WO + D, 0:D]
    w1   = p_ref[R_W1:R_W1 + D, 0:F]
    w2   = p_ref[R_W2:R_W2 + F, 0:D]
    wout = p_ref[R_WOUT:R_WOUT + D, :]            # (D, PAD)
    bqkv = p_ref[R_BQKV:R_BQKV + 1, 0:3 * D]      # (1, 3D)
    bo   = p_ref[R_BO:R_BO + 1, 0:D]
    b1   = p_ref[R_B1:R_B1 + 1, 0:F]
    b2   = p_ref[R_B2:R_B2 + 1, 0:D]
    ln1_g = p_ref[R_LN1G:R_LN1G + 1, 0:D]
    ln1_b = p_ref[R_LN1B:R_LN1B + 1, 0:D]
    ln2_g = p_ref[R_LN2G:R_LN2G + 1, 0:D]
    ln2_b = p_ref[R_LN2B:R_LN2B + 1, 0:D]
    b_out = p_ref[R_BOUT:R_BOUT + 1, :]           # (1, PAD)
    pos   = p_ref[R_POS:R_POS + S, 0:D]           # (S, D)

    # ---- preamble: fused positional encoding, flatten batch x seq -----------
    x = x_ref[...] + pos[None]                    # (B, S, D)
    xf = x.reshape(B * S, D)                      # (16, 32)

    # ---- fused Q/K/V projection (one MXU push; 1/sqrt(DH) folded into W_q) --
    qkv = jnp.dot(xf, wqkv, preferred_element_type=jnp.float32) + bqkv
    q = qkv[:, :D].reshape(B, S, D)
    k = qkv[:, D:2 * D].reshape(B, S, D)
    v = qkv[:, 2 * D:].reshape(B, S, D)

    # ---- additive key-padding mask: (B, 1, S), query-independent ------------
    # NOTE: length == 0 would give a uniform softmax over padding (finite),
    # unlike PyTorch's NaN for a fully-masked row; benign for length >= 1.
    kpos = lax.broadcasted_iota(jnp.int32, (B, 1, S), 2)
    bidx = lax.broadcasted_iota(jnp.int32, (B, 1, S), 0)
    lens = jnp.full((B, 1, S), lengths_ref[0], dtype=jnp.int32)
    for b in range(1, B):                         # static loop, B small
        lens = jnp.where(bidx == b, lengths_ref[b], lens)
    mask_bias = jnp.where(kpos < lens, 0.0, -1e30).astype(jnp.float32)  # (B,1,S)
    mask_all = jnp.concatenate([mask_bias] * H, axis=0)                 # (H*B,1,S)

    # ---- multi-head self attention: per-head QK dots, ONE stacked softmax ---
    scores = []
    for h in range(H):                            # static loop, H small
        sl = slice(h * DH, (h + 1) * DH)
        scores.append(jnp.einsum('bqd,bkd->bqk', q[:, :, sl], k[:, :, sl],
                                 preferred_element_type=jnp.float32))
    s_all = jnp.concatenate(scores, axis=0) + mask_all      # (H*B, S, S)
    s_all = s_all - jnp.max(s_all, axis=-1, keepdims=True)
    p_all = jnp.exp(s_all)
    p_all = p_all * pl.reciprocal(jnp.sum(p_all, axis=-1, keepdims=True),
                                  approx=True)

    head_outs = []
    for h in range(H):
        sl = slice(h * DH, (h + 1) * DH)
        head_outs.append(jnp.einsum('bqk,bkd->bqd',
                                    p_all[h * B:(h + 1) * B], v[:, :, sl],
                                    preferred_element_type=jnp.float32))
    attn = jnp.concatenate(head_outs, axis=-1).reshape(B * S, D)
    attn = jnp.dot(attn, wo, preferred_element_type=jnp.float32) + bo

    h1 = _layer_norm(xf + attn, ln1_g, ln1_b)

    # ---- feed forward --------------------------------------------------------
    ff = jnp.dot(h1, w1, preferred_element_type=jnp.float32) + b1
    ff = jnp.maximum(ff, 0.0)
    ff = jnp.dot(ff, w2, preferred_element_type=jnp.float32) + b2

    h2 = _layer_norm(h1 + ff, ln2_g, ln2_b)

    # ---- fused output: one lane-dense (B*S, 128) slab ------------------------
    # wout = [ I_D | w_head | 0 ]  =>  slab[:, :D]    == h2 (exact pass-through),
    #                                  slab[:, D:D+O] == h2 @ w_head + b_head.
    # HIGHEST precision keeps the identity copy / logits f32-exact (cheap here:
    # the kernel is launch/issue bound, not MXU bound).
    slab = jnp.dot(h2, wout, preferred_element_type=jnp.float32,
                   precision=lax.Precision.HIGHEST) + b_out
    out_ref[...] = slab.reshape(B, S, PAD).astype(out_ref.dtype)


# ------------------------------ the wrapper ----------------------------------
@jax.jit
def _run_pallas(lengths, x, param_slab):
    grid_spec = pltpu.PrefetchScalarGridSpec(
        num_scalar_prefetch=1,
        grid=(1,),                    # single step: whole problem fits one body
        in_specs=[
            pl.BlockSpec((B, S, D), lambda i, lens: (0, 0, 0)),       # tokens
            pl.BlockSpec((P_ROWS, PAD), lambda i, lens: (0, 0)),      # params
        ],
        out_specs=pl.BlockSpec((B, S, PAD), lambda i, lens: (0, 0, 0)),
    )

    slab = pl.pallas_call(
        transformer_kernel,
        out_shape=jax.ShapeDtypeStruct((B, S, PAD), jnp.float32),
        grid_spec=grid_spec,
        compiler_params=pltpu.CompilerParams(
            # single grid step on one TensorCore; batching many module calls
            # into a leading 'parallel' grid axis is the lever for v7x's 2nd TC.
            dimension_semantics=("arbitrary",)),
    )(lengths, x, param_slab)

    repr_out = slab[..., :D]          # (B, S, D) transformer representation
    head_out = slab[..., D:D + O]     # (B, S, O) output-module logits
    return repr_out, head_out


def transformer_weighting_forward(token_repr, lengths_host, param_slab):
    """Forward of TransformerWeightingModule.

    token_repr: (B, S, D) float32.
    lengths_host: host-side numpy int array of shape (B,) — accepted on host so
      the ragged compute_layer slicing needs no blocking device->host sync.
    Returns (ret, token_repr_out) mirroring the PyTorch module:
      ret: dict name -> list of per-batch (length_b, O) arrays
      token_repr_out: (B, S, D)  (== transformer(token_repr).transpose(0,1))
    """
    # dropout_input / dropout_output are identity at inference.
    # TODO(synk): training-mode dropout (stochastic masking) not implemented.
    lengths_dev = jnp.asarray(lengths_host, dtype=jnp.int32)
    repr_out, head_out = _run_pallas(lengths_dev, token_repr, param_slab)

    # compute_layer: ragged per-batch slicing of head outputs (Python glue).
    ret = {"head": [head_out[b, : int(lengths_host[b])] for b in range(B)]}
    return ret, repr_out


# ------------------------------ parameters -----------------------------------
def init_params(key):
    """Build raw module weights and pack them into one (P_ROWS, 128) slab."""
    keys = jax.random.split(key, 10)

    def w(k, shape, scale=0.05):
        return np.asarray(scale * jax.random.normal(k, shape), np.float32)

    # sinusoidal positional encoding (deterministic)
    pos = np.arange(S)[:, None]
    i = np.arange(D)[None, :]
    angle = pos / np.power(10000.0, (2 * (i // 2)) / D)
    pe = np.where(i % 2 == 0, np.sin(angle), np.cos(angle)).astype(np.float32)

    wq, wk, wv = w(keys[0], (D, D)), w(keys[1], (D, D)), w(keys[2], (D, D))
    bq, bk, bv = w(keys[3], (1, D), 0.02), w(keys[4], (1, D), 0.02), w(keys[5], (1, D), 0.02)
    wh = w(keys[6], (D, O))
    bh = w(keys[7], (1, O), 0.02)
    wo = w(keys[8], (D, D))
    w1 = w(keys[9], (D, F))
    w2 = w(jax.random.fold_in(key, 123), (F, D))

    # fused QKV projection, with the 1/sqrt(DH) attention scale folded into Q.
    scale = np.float32(1.0 / np.sqrt(DH))
    wqkv = np.concatenate([wq * scale, wk, wv], axis=1)              # (D, 3D)
    bqkv = np.concatenate([bq * scale, bk, bv], axis=1)              # (1, 3D)

    # fused lane-dense output matmul: [ identity copy of repr | head | zero pad ]
    w_out = np.concatenate(
        [np.eye(D, dtype=np.float32), wh,
         np.zeros((D, PAD - D - O), np.float32)], axis=1)            # (D, PAD)
    b_out = np.concatenate(
        [np.zeros((1, D), np.float32), bh,
         np.zeros((1, PAD - D - O), np.float32)], axis=1)            # (1, PAD)

    # ---- pack everything into ONE lane-dense slab (single DMA at run time) --
    slab = np.zeros((P_ROWS, PAD), np.float32)

    def put(row, arr):
        arr = np.asarray(arr, np.float32)
        slab[row:row + arr.shape[0], :arr.shape[1]] = arr

    put(R_WQKV, wqkv)
    put(R_WO, wo)
    put(R_W1, w1)
    put(R_W2, w2)
    put(R_WOUT, w_out)
    put(R_BQKV, bqkv)
    put(R_BO, np.zeros((1, D), np.float32))          # attention out-proj bias
    put(R_B1, np.zeros((1, F), np.float32))
    put(R_B2, np.zeros((1, D), np.float32))
    put(R_LN1G, np.ones((1, D), np.float32))
    put(R_LN1B, np.zeros((1, D), np.float32))
    put(R_LN2G, np.ones((1, D), np.float32))
    put(R_LN2B, np.zeros((1, D), np.float32))
    put(R_BOUT, b_out)
    put(R_POS, pe)

    return jnp.asarray(slab)


# --------------------------------- main ---------------------------------------
if __name__ == "__main__":
    key = jax.random.PRNGKey(0)
    k_in, k_par = jax.random.split(key)

    token_repr = jax.random.normal(k_in, (B, S, D), dtype=jnp.float32)
    lengths_host = np.array([8, 5], dtype=np.int32)
    param_slab = init_params(k_par)

    ret, token_repr_out = transformer_weighting_forward(token_repr, lengths_host, param_slab)

    jax.block_until_ready(token_repr_out)
    for t in ret["head"]:
        jax.block_until_ready(t)

    assert token_repr_out.shape == (B, S, D)
    assert ret["head"][0].shape == (8, O)
    assert ret["head"][1].shape == (5, O)
    assert bool(jnp.all(jnp.isfinite(token_repr_out)))
    for t in ret["head"]:
        assert bool(jnp.all(jnp.isfinite(t)))

    print("KERNEL_OK")
</pallas_src>

<mosaic_0001>
module attributes {stable_mosaic.version = 11 : i64} {
  func.func @transformer_kernel(%arg0: i32, %arg1: memref<2xi32, #tpu.memory_space<smem>>, %arg2: memref<2x8x32xf32, #tpu.memory_space<vmem>>, %arg3: memref<216x128xf32, #tpu.memory_space<vmem>>, %arg4: memref<2x8x128xf32, #tpu.memory_space<vmem>>) attributes {dimension_semantics = [#tpu.dimension_semantics<arbitrary>], iteration_bounds = array<i64: 1>, scalar_prefetch = 1 : i64, scratch_operands = 0 : i64, tpu.core_type = #tpu.core_type<tc>, window_params = [{pipeline_mode = #tpu.pipeline_mode<synchronous>, transform_indices = @transform_0, window_bounds = array<i64: 2, 8, 32>}, {pipeline_mode = #tpu.pipeline_mode<synchronous>, transform_indices = @transform_1, window_bounds = array<i64: 216, 128>}, {pipeline_mode = #tpu.pipeline_mode<synchronous>, transform_indices = @transform_2, window_bounds = array<i64: 2, 8, 128>}]} {
    %c0 = arith.constant 0 : index
    %c0_0 = arith.constant 0 : index
    %0 = vector.load %arg3[%c0, %c0_0] : memref<216x128xf32, #tpu.memory_space<vmem>>, vector<32x96xf32>
    %c32 = arith.constant 32 : index
    %c0_1 = arith.constant 0 : index
    %1 = vector.load %arg3[%c32, %c0_1] : memref<216x128xf32, #tpu.memory_space<vmem>>, vector<32x32xf32>
    %c64 = arith.constant 64 : index
    %c0_2 = arith.constant 0 : index
    %2 = vector.load %arg3[%c64, %c0_2] : memref<216x128xf32, #tpu.memory_space<vmem>>, vector<32x64xf32>
    %c96 = arith.constant 96 : index
    %c0_3 = arith.constant 0 : index
    %3 = vector.load %arg3[%c96, %c0_3] : memref<216x128xf32, #tpu.memory_space<vmem>>, vector<64x32xf32>
    %c160 = arith.constant 160 : index
    %c0_4 = arith.constant 0 : index
    %4 = vector.load %arg3[%c160, %c0_4] : memref<216x128xf32, #tpu.memory_space<vmem>>, vector<32x128xf32>
    %c192 = arith.constant 192 : index
    %c0_5 = arith.constant 0 : index
    %5 = vector.load %arg3[%c192, %c0_5] : memref<216x128xf32, #tpu.memory_space<vmem>>, vector<1x96xf32>
    %c193 = arith.constant 193 : index
    %c0_6 = arith.constant 0 : index
    %6 = vector.load %arg3[%c193, %c0_6] : memref<216x128xf32, #tpu.memory_space<vmem>>, vector<1x32xf32>
    %c194 = arith.constant 194 : index
    %c0_7 = arith.constant 0 : index
    %7 = vector.load %arg3[%c194, %c0_7] : memref<216x128xf32, #tpu.memory_space<vmem>>, vector<1x64xf32>
    %c195 = arith.constant 195 : index
    %c0_8 = arith.constant 0 : index
    %8 = vector.load %arg3[%c195, %c0_8] : memref<216x128xf32, #tpu.memory_space<vmem>>, vector<1x32xf32>
    %c196 = arith.constant 196 : index
    %c0_9 = arith.constant 0 : index
    %9 = vector.load %arg3[%c196, %c0_9] : memref<216x128xf32, #tpu.memory_space<vmem>>, vector<1x32xf32>
    %c197 = arith.constant 197 : index
    %c0_10 = arith.constant 0 : index
    %10 = vector.load %arg3[%c197, %c0_10] : memref<216x128xf32, #tpu.memory_space<vmem>>, vector<1x32xf32>
    %c198 = arith.constant 198 : index
    %c0_11 = arith.constant 0 : index
    %11 = vector.load %arg3[%c198, %c0_11] : memref<216x128xf32, #tpu.memory_space<vmem>>, vector<1x32xf32>
    %c199 = arith.constant 199 : index
    %c0_12 = arith.constant 0 : index
    %12 = vector.load %arg3[%c199, %c0_12] : memref<216x128xf32, #tpu.memory_space<vmem>>, vector<1x32xf32>
    %c200 = arith.constant 200 : index
    %c0_13 = arith.constant 0 : index
    %13 = vector.load %arg3[%c200, %c0_13] : memref<216x128xf32, #tpu.memory_space<vmem>>, vector<1x128xf32>
    %c208 = arith.constant 208 : index
    %c0_14 = arith.constant 0 : index
    %14 = vector.load %arg3[%c208, %c0_14] : memref<216x128xf32, #tpu.memory_space<vmem>>, vector<8x32xf32>
    %c0_15 = arith.constant 0 : index
    %c0_16 = arith.constant 0 : index
    %c0_17 = arith.constant 0 : index
    %15 = vector.load %arg2[%c0_15, %c0_16, %c0_17] : memref<2x8x32xf32, #tpu.memory_space<vmem>>, vector<2x8x32xf32>
    %16 = vector.shape_cast %14 : vector<8x32xf32> to vector<1x8x32xf32>
    %17 = vector.broadcast %16 : vector<1x8x32xf32> to vector<2x8x32xf32>
    %18 = arith.addf %15, %17 : vector<2x8x32xf32>
    %19 = vector.shape_cast %18 : vector<2x8x32xf32> to vector<16x32xf32>
    %cst = arith.constant dense<0.000000e+00> : vector<16x96xf32>
    %20 = tpu.matmul %19, %0, %cst {dimension_numbers = #tpu.dot_dimension_numbers<[1], [0], [0], [1], [0, 0, 1, 1], [], []>} : vector<16x32xf32>, vector<32x96xf32>, vector<16x96xf32> -> vector<16x96xf32>
    %21 = vector.broadcast %5 : vector<1x96xf32> to vector<16x96xf32>
    %22 = arith.addf %20, %21 : vector<16x96xf32>
    %23 = vector.extract_strided_slice %22 {offsets = [0, 0], sizes = [16, 32], strides = [1, 1]} : vector<16x96xf32> to vector<16x32xf32>
    %24 = vector.shape_cast %23 : vector<16x32xf32> to vector<2x8x32xf32>
    %25 = vector.extract_strided_slice %22 {offsets = [0, 32], sizes = [16, 32], strides = [1, 1]} : vector<16x96xf32> to vector<16x32xf32>
    %26 = vector.shape_cast %25 : vector<16x32xf32> to vector<2x8x32xf32>
    %27 = vector.extract_strided_slice %22 {offsets = [0, 64], sizes = [16, 32], strides = [1, 1]} : vector<16x96xf32> to vector<16x32xf32>
    %28 = vector.shape_cast %27 : vector<16x32xf32> to vector<2x8x32xf32>
    %29 = tpu.iota {dimensions = array<i32: 2>} : vector<2x1x8xi32>
    %30 = tpu.iota {dimensions = array<i32: 0>} : vector<2x1x8xi32>
    %c0_18 = arith.constant 0 : index
    %31 = memref.load %arg1[%c0_18] : memref<2xi32, #tpu.memory_space<smem>>
    %32 = vector.broadcast %31 : i32 to vector<2x1x8xi32>
    %c1_i32 = arith.constant 1 : i32
    %33 = vector.broadcast %c1_i32 : i32 to vector<2x1x8xi32>
    %34 = arith.cmpi eq, %30, %33 : vector<2x1x8xi32>
    %c1 = arith.constant 1 : index
    %35 = memref.load %arg1[%c1] : memref<2xi32, #tpu.memory_space<smem>>
    %36 = vector.broadcast %35 : i32 to vector<2x1x8xi32>
    %37 = arith.select %34, %36, %32 : vector<2x1x8xi1>, vector<2x1x8xi32>
    %38 = arith.cmpi slt, %29, %37 : vector<2x1x8xi32>
    %cst_19 = arith.constant 0.000000e+00 : f32
    %cst_20 = arith.constant -1.000000e+30 : f32
    %39 = vector.broadcast %cst_19 : f32 to vector<2x1x8xf32>
    %40 = vector.broadcast %cst_20 : f32 to vector<2x1x8xf32>
    %41 = arith.select %38, %39, %40 : vector<2x1x8xi1>, vector<2x1x8xf32>
    %42 = tpu.concatenate %41, %41, %41, %41 in 0 : vector<2x1x8xf32>, vector<2x1x8xf32>, vector<2x1x8xf32>, vector<2x1x8xf32> -> vector<8x1x8xf32>
    %43 = vector.extract_strided_slice %24 {offsets = [0, 0, 0], sizes = [2, 8, 8], strides = [1, 1, 1]} : vector<2x8x32xf32> to vector<2x8x8xf32>
    %44 = vector.extract_strided_slice %26 {offsets = [0, 0, 0], sizes = [2, 8, 8], strides = [1, 1, 1]} : vector<2x8x32xf32> to vector<2x8x8xf32>
    "tpu.trace_start"() <{level = 10 : i32, message = "bqd,bkd->bqk"}> : () -> ()
    %cst_21 = arith.constant dense<0.000000e+00> : vector<2x8x8xf32>
    %45 = tpu.matmul %43, %44, %cst_21 {dimension_numbers = #tpu.dot_dimension_numbers<[2], [2], [1], [1], [0, 0, 0, 1, 1, 1], [0], [0]>} : vector<2x8x8xf32>, vector<2x8x8xf32>, vector<2x8x8xf32> -> vector<2x8x8xf32>
    "tpu.trace_stop"() : () -> ()
    %46 = vector.extract_strided_slice %24 {offsets = [0, 0, 8], sizes = [2, 8, 8], strides = [1, 1, 1]} : vector<2x8x32xf32> to vector<2x8x8xf32>
    %47 = vector.extract_strided_slice %26 {offsets = [0, 0, 8], sizes = [2, 8, 8], strides = [1, 1, 1]} : vector<2x8x32xf32> to vector<2x8x8xf32>
    "tpu.trace_start"() <{level = 10 : i32, message = "bqd,bkd->bqk"}> : () -> ()
    %cst_22 = arith.constant dense<0.000000e+00> : vector<2x8x8xf32>
    %48 = tpu.matmul %46, %47, %cst_22 {dimension_numbers = #tpu.dot_dimension_numbers<[2], [2], [1], [1], [0, 0, 0, 1, 1, 1], [0], [0]>} : vector<2x8x8xf32>, vector<2x8x8xf32>, vector<2x8x8xf32> -> vector<2x8x8xf32>
    "tpu.trace_stop"() : () -> ()
    %49 = vector.extract_strided_slice %24 {offsets = [0, 0, 16], sizes = [2, 8, 8], strides = [1, 1, 1]} : vector<2x8x32xf32> to vector<2x8x8xf32>
    %50 = vector.extract_strided_slice %26 {offsets = [0, 0, 16], sizes = [2, 8, 8], strides = [1, 1, 1]} : vector<2x8x32xf32> to vector<2x8x8xf32>
    "tpu.trace_start"() <{level = 10 : i32, message = "bqd,bkd->bqk"}> : () -> ()
    %cst_23 = arith.constant dense<0.000000e+00> : vector<2x8x8xf32>
    %51 = tpu.matmul %49, %50, %cst_23 {dimension_numbers = #tpu.dot_dimension_numbers<[2], [2], [1], [1], [0, 0, 0, 1, 1, 1], [0], [0]>} : vector<2x8x8xf32>, vector<2x8x8xf32>, vector<2x8x8xf32> -> vector<2x8x8xf32>
    "tpu.trace_stop"() : () -> ()
    %52 = vector.extract_strided_slice %24 {offsets = [0, 0, 24], sizes = [2, 8, 8], strides = [1, 1, 1]} : vector<2x8x32xf32> to vector<2x8x8xf32>
    %53 = vector.extract_strided_slice %26 {offsets = [0, 0, 24], sizes = [2, 8, 8], strides = [1, 1, 1]} : vector<2x8x32xf32> to vector<2x8x8xf32>
    "tpu.trace_start"() <{level = 10 : i32, message = "bqd,bkd->bqk"}> : () -> ()
    %cst_24 = arith.constant dense<0.000000e+00> : vector<2x8x8xf32>
    %54 = tpu.matmul %52, %53, %cst_24 {dimension_numbers = #tpu.dot_dimension_numbers<[2], [2], [1], [1], [0, 0, 0, 1, 1, 1], [0], [0]>} : vector<2x8x8xf32>, vector<2x8x8xf32>, vector<2x8x8xf32> -> vector<2x8x8xf32>
    "tpu.trace_stop"() : () -> ()
    %55 = tpu.concatenate %45, %48, %51, %54 in 0 : vector<2x8x8xf32>, vector<2x8x8xf32>, vector<2x8x8xf32>, vector<2x8x8xf32> -> vector<8x8x8xf32>
    %56 = vector.broadcast %42 : vector<8x1x8xf32> to vector<8x8x8xf32>
    %57 = arith.addf %55, %56 : vector<8x8x8xf32>
    %cst_25 = arith.constant dense<0xFF800000> : vector<8x8xf32>
    %58 = vector.multi_reduction <maximumf>, %57, %cst_25 [2] : vector<8x8x8xf32> to vector<8x8xf32>
    %59 = vector.shape_cast %58 : vector<8x8xf32> to vector<8x8x1xf32>
    %60 = vector.broadcast %59 : vector<8x8x1xf32> to vector<8x8x8xf32>
    %61 = arith.subf %57, %60 : vector<8x8x8xf32>
    %62 = math.exp %61 : vector<8x8x8xf32>
    %cst_26 = arith.constant dense<0.000000e+00> : vector<8x8xf32>
    %63 = vector.multi_reduction <add>, %62, %cst_26 [2] : vector<8x8x8xf32> to vector<8x8xf32>
    %64 = vector.shape_cast %63 : vector<8x8xf32> to vector<8x8x1xf32>
    %65 = tpu.reciprocal %64 {approx = true} : vector<8x8x1xf32> -> vector<8x8x1xf32>
    %66 = vector.broadcast %65 : vector<8x8x1xf32> to vector<8x8x8xf32>
    %67 = arith.mulf %62, %66 : vector<8x8x8xf32>
    %68 = vector.extract_strided_slice %67 {offsets = [0, 0, 0], sizes = [2, 8, 8], strides = [1, 1, 1]} : vector<8x8x8xf32> to vector<2x8x8xf32>
    %69 = vector.extract_strided_slice %28 {offsets = [0, 0, 0], sizes = [2, 8, 8], strides = [1, 1, 1]} : vector<2x8x32xf32> to vector<2x8x8xf32>
    "tpu.trace_start"() <{level = 10 : i32, message = "bqk,bkd->bqd"}> : () -> ()
    %cst_27 = arith.constant dense<0.000000e+00> : vector<2x8x8xf32>
    %70 = tpu.matmul %68, %69, %cst_27 {dimension_numbers = #tpu.dot_dimension_numbers<[2], [1], [1], [2], [0, 0, 0, 1, 1, 2], [0], [0]>} : vector<2x8x8xf32>, vector<2x8x8xf32>, vector<2x8x8xf32> -> vector<2x8x8xf32>
    "tpu.trace_stop"() : () -> ()
    %71 = vector.extract_strided_slice %67 {offsets = [2, 0, 0], sizes = [2, 8, 8], strides = [1, 1, 1]} : vector<8x8x8xf32> to vector<2x8x8xf32>
    %72 = vector.extract_strided_slice %28 {offsets = [0, 0, 8], sizes = [2, 8, 8], strides = [1, 1, 1]} : vector<2x8x32xf32> to vector<2x8x8xf32>
    "tpu.trace_start"() <{level = 10 : i32, message = "bqk,bkd->bqd"}> : () -> ()
    %cst_28 = arith.constant dense<0.000000e+00> : vector<2x8x8xf32>
    %73 = tpu.matmul %71, %72, %cst_28 {dimension_numbers = #tpu.dot_dimension_numbers<[2], [1], [1], [2], [0, 0, 0, 1, 1, 2], [0], [0]>} : vector<2x8x8xf32>, vector<2x8x8xf32>, vector<2x8x8xf32> -> vector<2x8x8xf32>
    "tpu.trace_stop"() : () -> ()
    %74 = vector.extract_strided_slice %67 {offsets = [4, 0, 0], sizes = [2, 8, 8], strides = [1, 1, 1]} : vector<8x8x8xf32> to vector<2x8x8xf32>
    %75 = vector.extract_strided_slice %28 {offsets = [0, 0, 16], sizes = [2, 8, 8], strides = [1, 1, 1]} : vector<2x8x32xf32> to vector<2x8x8xf32>
    "tpu.trace_start"() <{level = 10 : i32, message = "bqk,bkd->bqd"}> : () -> ()
    %cst_29 = arith.constant dense<0.000000e+00> : vector<2x8x8xf32>
    %76 = tpu.matmul %74, %75, %cst_29 {dimension_numbers = #tpu.dot_dimension_numbers<[2], [1], [1], [2], [0, 0, 0, 1, 1, 2], [0], [0]>} : vector<2x8x8xf32>, vector<2x8x8xf32>, vector<2x8x8xf32> -> vector<2x8x8xf32>
    "tpu.trace_stop"() : () -> ()
    %77 = vector.extract_strided_slice %67 {offsets = [6, 0, 0], sizes = [2, 8, 8], strides = [1, 1, 1]} : vector<8x8x8xf32> to vector<2x8x8xf32>
    %78 = vector.extract_strided_slice %28 {offsets = [0, 0, 24], sizes = [2, 8, 8], strides = [1, 1, 1]} : vector<2x8x32xf32> to vector<2x8x8xf32>
    "tpu.trace_start"() <{level = 10 : i32, message = "bqk,bkd->bqd"}> : () -> ()
    %cst_30 = arith.constant dense<0.000000e+00> : vector<2x8x8xf32>
    %79 = tpu.matmul %77, %78, %cst_30 {dimension_numbers = #tpu.dot_dimension_numbers<[2], [1], [1], [2], [0, 0, 0, 1, 1, 2], [0], [0]>} : vector<2x8x8xf32>, vector<2x8x8xf32>, vector<2x8x8xf32> -> vector<2x8x8xf32>
    "tpu.trace_stop"() : () -> ()
    %80 = tpu.concatenate %70, %73, %76, %79 in 2 : vector<2x8x8xf32>, vector<2x8x8xf32>, vector<2x8x8xf32>, vector<2x8x8xf32> -> vector<2x8x32xf32>
    %81 = vector.shape_cast %80 : vector<2x8x32xf32> to vector<16x32xf32>
    %cst_31 = arith.constant dense<0.000000e+00> : vector<16x32xf32>
    %82 = tpu.matmul %81, %1, %cst_31 {dimension_numbers = #tpu.dot_dimension_numbers<[1], [0], [0], [1], [0, 0, 1, 1], [], []>} : vector<16x32xf32>, vector<32x32xf32>, vector<16x32xf32> -> vector<16x32xf32>
    %83 = vector.broadcast %6 : vector<1x32xf32> to vector<16x32xf32>
    %84 = arith.addf %82, %83 : vector<16x32xf32>
    %85 = arith.addf %19, %84 : vector<16x32xf32>
    %cst_32 = arith.constant dense<0.000000e+00> : vector<16xf32>
    %86 = vector.multi_reduction <add>, %85, %cst_32 [1] : vector<16x32xf32> to vector<16xf32>
    %87 = vector.shape_cast %86 : vector<16xf32> to vector<16x1xf32>
    %cst_33 = arith.constant 3.200000e+01 : f32
    %88 = vector.broadcast %cst_33 : f32 to vector<16x1xf32>
    %89 = arith.divf %87, %88 : vector<16x1xf32>
    %90 = vector.broadcast %89 : vector<16x1xf32> to vector<16x32xf32>
    %91 = arith.subf %85, %90 : vector<16x32xf32>
    %92 = arith.mulf %91, %91 : vector<16x32xf32>
    %cst_34 = arith.constant dense<0.000000e+00> : vector<16xf32>
    %93 = vector.multi_reduction <add>, %92, %cst_34 [1] : vector<16x32xf32> to vector<16xf32>
    %94 = vector.shape_cast %93 : vector<16xf32> to vector<16x1xf32>
    %cst_35 = arith.constant 3.200000e+01 : f32
    %95 = vector.broadcast %cst_35 : f32 to vector<16x1xf32>
    %96 = arith.divf %94, %95 : vector<16x1xf32>
    %97 = vector.broadcast %89 : vector<16x1xf32> to vector<16x32xf32>
    %98 = arith.subf %85, %97 : vector<16x32xf32>
    %cst_36 = arith.constant 9.99999974E-6 : f32
    %99 = vector.broadcast %cst_36 : f32 to vector<16x1xf32>
    %100 = arith.addf %96, %99 : vector<16x1xf32>
    %101 = math.rsqrt %100 : vector<16x1xf32>
    %102 = vector.broadcast %101 : vector<16x1xf32> to vector<16x32xf32>
    %103 = arith.mulf %98, %102 : vector<16x32xf32>
    %104 = vector.broadcast %9 : vector<1x32xf32> to vector<16x32xf32>
    %105 = arith.mulf %103, %104 : vector<16x32xf32>
    %106 = vector.broadcast %10 : vector<1x32xf32> to vector<16x32xf32>
    %107 = arith.addf %105, %106 : vector<16x32xf32>
    %cst_37 = arith.constant dense<0.000000e+00> : vector<16x64xf32>
    %108 = tpu.matmul %107, %2, %cst_37 {dimension_numbers = #tpu.dot_dimension_numbers<[1], [0], [0], [1], [0, 0, 1, 1], [], []>} : vector<16x32xf32>, vector<32x64xf32>, vector<16x64xf32> -> vector<16x64xf32>
    %109 = vector.broadcast %7 : vector<1x64xf32> to vector<16x64xf32>
    %110 = arith.addf %108, %109 : vector<16x64xf32>
    %cst_38 = arith.constant 0.000000e+00 : f32
    %111 = vector.broadcast %cst_38 : f32 to vector<16x64xf32>
    %112 = arith.maximumf %110, %111 : vector<16x64xf32>
    %cst_39 = arith.constant dense<0.000000e+00> : vector<16x32xf32>
    %113 = tpu.matmul %112, %3, %cst_39 {dimension_numbers = #tpu.dot_dimension_numbers<[1], [0], [0], [1], [0, 0, 1, 1], [], []>} : vector<16x64xf32>, vector<64x32xf32>, vector<16x32xf32> -> vector<16x32xf32>
    %114 = vector.broadcast %8 : vector<1x32xf32> to vector<16x32xf32>
    %115 = arith.addf %113, %114 : vector<16x32xf32>
    %116 = arith.addf %107, %115 : vector<16x32xf32>
    %cst_40 = arith.constant dense<0.000000e+00> : vector<16xf32>
    %117 = vector.multi_reduction <add>, %116, %cst_40 [1] : vector<16x32xf32> to vector<16xf32>
    %118 = vector.shape_cast %117 : vector<16xf32> to vector<16x1xf32>
    %cst_41 = arith.constant 3.200000e+01 : f32
    %119 = vector.broadcast %cst_41 : f32 to vector<16x1xf32>
    %120 = arith.divf %118, %119 : vector<16x1xf32>
    %121 = vector.broadcast %120 : vector<16x1xf32> to vector<16x32xf32>
    %122 = arith.subf %116, %121 : vector<16x32xf32>
    %123 = arith.mulf %122, %122 : vector<16x32xf32>
    %cst_42 = arith.constant dense<0.000000e+00> : vector<16xf32>
    %124 = vector.multi_reduction <add>, %123, %cst_42 [1] : vector<16x32xf32> to vector<16xf32>
    %125 = vector.shape_cast %124 : vector<16xf32> to vector<16x1xf32>
    %cst_43 = arith.constant 3.200000e+01 : f32
    %126 = vector.broadcast %cst_43 : f32 to vector<16x1xf32>
    %127 = arith.divf %125, %126 : vector<16x1xf32>
    %128 = vector.broadcast %120 : vector<16x1xf32> to vector<16x32xf32>
    %129 = arith.subf %116, %128 : vector<16x32xf32>
    %cst_44 = arith.constant 9.99999974E-6 : f32
    %130 = vector.broadcast %cst_44 : f32 to vector<16x1xf32>
    %131 = arith.addf %127, %130 : vector<16x1xf32>
    %132 = math.rsqrt %131 : vector<16x1xf32>
    %133 = vector.broadcast %132 : vector<16x1xf32> to vector<16x32xf32>
    %134 = arith.mulf %129, %133 : vector<16x32xf32>
    %135 = vector.broadcast %11 : vector<1x32xf32> to vector<16x32xf32>
    %136 = arith.mulf %134, %135 : vector<16x32xf32>
    %137 = vector.broadcast %12 : vector<1x32xf32> to vector<16x32xf32>
    %138 = arith.addf %136, %137 : vector<16x32xf32>
    %cst_45 = arith.constant dense<0.000000e+00> : vector<16x128xf32>
    %139 = tpu.matmul %138, %4, %cst_45 {dimension_numbers = #tpu.dot_dimension_numbers<[1], [0], [0], [1], [0, 0, 1, 1], [], []>, precision = #tpu.contract_precision<fp32>} : vector<16x32xf32>, vector<32x128xf32>, vector<16x128xf32> -> vector<16x128xf32>
    %140 = vector.broadcast %13 : vector<1x128xf32> to vector<16x128xf32>
    %141 = arith.addf %139, %140 : vector<16x128xf32>
    %142 = vector.shape_cast %141 : vector<16x128xf32> to vector<2x8x128xf32>
    %c0_46 = arith.constant 0 : index
    %c0_47 = arith.constant 0 : index
    %c0_48 = arith.constant 0 : index
    %143 = vector.load %arg4[%c0_46, %c0_47, %c0_48] : memref<2x8x128xf32, #tpu.memory_space<vmem>>, vector<2x8x128xf32>
    tpu.vector_store %arg4[%c0_46, %c0_47, %c0_48], %142 {strides = array<i32>} : memref<2x8x128xf32, #tpu.memory_space<vmem>>, vector<2x8x128xf32>,
    return
  }
  func.func @transform_0(%arg0: i32, %arg1: memref<2xi32, #tpu.memory_space<smem>>) -> (i32, i32, i32) {
    %c0_i32 = arith.constant 0 : i32
    %c0_i32_0 = arith.constant 0 : i32
    %c0_i32_1 = arith.constant 0 : i32
    %c0_i32_2 = arith.constant 0 : i32
    return %c0_i32, %c0_i32_0, %c0_i32_1 : i32, i32, i32
  }
  func.func @transform_1(%arg0: i32, %arg1: memref<2xi32, #tpu.memory_space<smem>>) -> (i32, i32) {
    %c0_i32 = arith.constant 0 : i32
    %c0_i32_0 = arith.constant 0 : i32
    %c0_i32_1 = arith.constant 0 : i32
    return %c0_i32, %c0_i32_0 : i32, i32
  }
  func.func @transform_2(%arg0: i32, %arg1: memref<2xi32, #tpu.memory_space<smem>>) -> (i32, i32, i32) {
    %c0_i32 = arith.constant 0 : i32
    %c0_i32_0 = arith.constant 0 : i32
    %c0_i32_1 = arith.constant 0 : i32
    %c0_i32_2 = arith.constant 0 : i32
    return %c0_i32, %c0_i32_0, %c0_i32_1 : i32, i32, i32
  }
}

</mosaic_0001>

<bundles_post_ra>
// kernel: _run_pallas.1
= control target key start
LH: loop header
LB: loop body
LE: loop exit
PB: predicated region body
PF: predicated region fallthrough
CT: control target
= control target key end

     0   :  { %s3240_s0 = inlined_call_operand.hbm [shape: s32[2], index: 0, kind: input, shape index: {}]   ;;  %s3241_s1 = inlined_call_operand.hbm [shape: f32[2,8,32], index: 1, kind: input, shape index: {}]   ;;  %s3242_s2 = inlined_call_operand.hbm [shape: f32[216,128], index: 2, kind: input, shape index: {}]   ;;  %s3243_s3 = inlined_call_operand.vmem [shape: f32[2,8,128], index: 3, kind: output, shape index: {}]  }
   0x1   :  { %s2927_s14 = scalar_lea.hbm %s3240_s0, 16 }
   0x2   :  { %p2928_p0 = scmp.ne.s32.totalorder %s3240_s0, %s2927_s14  ;;  %p2931_p1 = scmp.lt.u32.totalorder %s2927_s14, %s3240_s0 }
   0x4   :  { %p2933_p2 = pnand %p2931_p1, %p2928_p0 }
   0x6   :  { %2936 = shalt.err (!%p2933_p2)  }
   0x7   :  { %s2987_s19 = smov [#allocation3]  }
   0x8   :  { %9 = dma.hbm_to_smem %s3240_s0, 16, %s2987_s19, [#allocation2] }
   0x9   :  { %2981 = dma.done.wait [#allocation2], 16 }
   0xa   :  { %2982 = vsyncadd [#allocation2], 4294967280 }
   0xb   :  { %11 = sfence }
   0xc   :  { %12 = vsyncpa [#allocation5], 0 }
   0xd   :  { %13 = vsyncpa [#allocation7], 0  ;;  %s2988_s22 = smov [#allocation4]   ;;  %s2937_s26 = scalar_lea.hbm %s3241_s1, 256 }
   0xe   :  { %s19_s23 = sshll.u32 %s2988_s22, 4  ;;  %p2938_p3 = scmp.ne.s32.totalorder %s3241_s1, %s2937_s26  ;;  %s20_s23 = int_to_ptr.vmem [resolvable:$true] %s19_s23 }
   0xf   :  { %p2941_p4 = scmp.lt.u32.totalorder %s2937_s26, %s3241_s1 }
  0x11   :  { %p2943_p5 = pnand %p2941_p4, %p2938_p3 }
  0x13   :  { %2946 = shalt.err (!%p2943_p5)
}
  0x14   :  { %s2947_s0 = scalar_lea.vmem %s20_s23, 256  ;;  %p2952_p7 = scmp.lt.s32.totalorder %s20_s23, %s20_s23 }
  0x15   :  { %p2948_p6 = scmp.ne.s32.totalorder %s20_s23, %s2947_s0  ;;  %p2953_p8 = scmp.lt.s32.totalorder %s2947_s0, %s2947_s0 }
  0x17   :  { %p2954_p9 = por %p2953_p8, %p2952_p7 }
  0x19   :  { %p2955_p10 = pnand %p2954_p9, %p2948_p6 }
  0x1b   :  { %2958 = shalt.err (!%p2955_p10)
}
  0x1c   :  { %s2989_s4 = smov 128   ;;  %s2990_s5 = smov 8  }
  0x1d   :  { %25 = dma.hbm_to_vmem [thread:$0]  %s3241_s1, 256, %s20_s23, [#allocation5], %s2989_s4, %s2989_s4, %s2990_s5  }
  0x1e   :  { %s2991_s8 = smov [#allocation6]   ;;  %s2959_s12 = scalar_lea.hbm %s3242_s2, 3456 }
  0x1f   :  { %s31_s9 = sshll.u32 %s2991_s8, 4  ;;  %p2960_p11 = scmp.ne.s32.totalorder %s3242_s2, %s2959_s12  ;;  %s32_s9 = int_to_ptr.vmem [resolvable:$true] %s31_s9 }
  0x20   :  { %p2963_p12 = scmp.lt.u32.totalorder %s2959_s12, %s3242_s2 }
  0x22   :  { %p2965_p13 = pnand %p2963_p12, %p2960_p11 }
  0x24   :  { %2968 = shalt.err (!%p2965_p13)
}
  0x25   :  { %s2969_s17 = scalar_lea.vmem %s32_s9, 3456  ;;  %p2974_p1 = scmp.lt.s32.totalorder %s32_s9, %s32_s9 }
  0x26   :  { %p2970_p0 = scmp.ne.s32.totalorder %s32_s9, %s2969_s17  ;;  %p2975_p2 = scmp.lt.s32.totalorder %s2969_s17, %s2969_s17 }
  0x28   :  { %p2976_p3 = por %p2975_p2, %p2974_p1 }
  0x2a   :  { %p2977_p4 = pnand %p2976_p3, %p2970_p0 }
  0x2c   :  { %2980 = shalt.err (!%p2977_p4)
}
  0x2d   :  { %37 = dma.hbm_to_vmem [thread:$0]  %s3242_s2, 3456, %s32_s9, [#allocation7], %s2989_s4, %s2989_s4, %s2990_s5  }
  0x2e   :  { %2983 = dma.done.wait [#allocation5], 256  }
  0x2f   :  { %2984 = vsyncadd [#allocation5], 4294967040 }
  0x30   :  { %2985 = dma.done.wait [#allocation7], 3456  }
  0x31   :  { %2986 = vsyncadd [#allocation7], 4294963840  ;;  %v44_v0 = vld [vmem:[#allocation6] sm:$0xff]  ;;  %v45_v1 = vld [vmem:[#allocation6 + $0x8] sm:$0xff]  ;;  %vm86_vm0 = vcmask 261120   ;;  %v2992_v11 = vmov 0.0   ;;  %v168_v31 = vlaneseq }
  0x32   :  { %v46_v2 = vld [vmem:[#allocation6 + $0x10] sm:$0xff]  ;;  %v2766_v3 = vpack.c.bf16 %v45_v1, %v44_v0  ;;  %v47_v4 = vld [vmem:[#allocation6 + $0x18] sm:$0xff]  ;;  %2579 = vmatprep.subr.mxu1 %v2992_v11  ;;  %vm2993_vm1 = vmmov 0   ;;  %v2430_v12 = vld [vmem:[#allocation6 + $0xc0] ss:$0 sm:$0xff]  ;;  %s2994_s2 = smov 88  }
  0x33   :  { %v77_v5 = vld [vmem:[#allocation6 + $0xd0] sm:$0xff]  ;;  %v2770_v7 = vpack.c.bf16 %v47_v4, %v46_v2  ;;  %v79_v9 = vld [vmem:[#allocation4 + $0x8] sm:$0xff]  ;;  %2581 = vmatprep.mubr.msk.f32.mxu1 %vm2993_vm1, %v2992_v11  ;;  %s2995_s19 = smov 96   ;;  %s2996_s20 = smov 120   ;;  %vm181_vm2 = vcmask 64512   ;;  %v169_v32 = vand.u32 127, %v168_v31 }
  0x34   :  { %v78_v6 = vld [vmem:[#allocation4] sm:$0xff]  ;;  %2767 = vmatprep.subr.bf16.mxu0 %v2766_v3  ;;  %v3070_v10 = vadd.f32 %v79_v9, %v77_v5  ;;  %s2997_s21 = smov 80   ;;  %s2998_s22 = smov 112   ;;  %v802_v34 = vshrl.u32 %v168_v31, 7  ;;  %v3001_v37 = vmov -1e+30  }
  0x35   :  { %v3066_v8 = vadd.f32 %v78_v6, %v77_v5  ;;  %2769 = vmatpush3.bf16.msra.mxu0 %v2766_v3  ;;  %s2999_s23 = smov 72   ;;  %s3000_s24 = smov 104   ;;  %vm1539_vm5 = vcmask 130048   ;;  %vm1542_vm6 = vcmask 195584   ;;  %vm1762_vm7 = vcmask 523264  }
  0x36   :  { %2771 = vmatprep.subr.bf16.mxu0 %v2770_v7  ;;  %s170_s25 = sld [smem:[#allocation3]]  ;;  %s2433_s26 = sld [smem:[#allocation3 + $0x1]]  ;;  %v803_v36 = vsub.s32 0, %v802_v34 }
  0x37   :  { %2576 = vmatprep.mubr.msk.f32.mxu0 %vm86_vm0, %v3066_v8  ;;  %s3002_s27 = smov 64   ;;  %s3003_s28 = smov 56  }
  0x38   :  { %s3004_s29 = smov 48   ;;  %s3005_s30 = smov 40  }
  0x39   :  { %2773 = vmatpush3.bf16.msra.mxu0 %v2770_v7  ;;  %s3006_s0 = smov 16   ;;  %s3007_s4 = smov 24  }
  0x3a   :  { %2589 = vmatprep.subr.mxu0 %v2992_v11 }
  0x3c   :  { %2577 = vmatmul.mubr.msk.f32.vlgmr.msra.gmra.mrb[0].mxu0 %vm86_vm0, %v3070_v10  ;;  %v171_v33 = vstv %s170_s25  ;;  %v173_v35 = vstv %s2433_s26 }
  0x3d   :  { %2591 = vmatprep.mubr.msk.f32.mxu0 %vm2993_vm1, %v2992_v11  ;;  %vm174_vm3 = vcmp.lt.s32.totalorder %v169_v32, %v171_v33  ;;  %vm175_vm4 = vcmp.lt.s32.totalorder %v169_v32, %v173_v35 }
  0x3e   :  { %v176_v38 = vsel %vm174_vm3, 0.0, %v3001_v37  ;;  %v177_v40 = vsel %vm175_vm4, 0.0, %v3001_v37 }
  0x3f   :  { %v804_v39 = vrot.slane %v176_v38, %v803_v36  ;;  %v808_v44 = vrot.slane %v177_v40, %v803_v36 }
 0x10f   :  { %v2578_v13 = vpop.f32.mrb[0].mxu0 }
 0x110   :  { %v3080_v14 = vadd.f32 %v2578_v13, %v2430_v12  ;;  %v159_v15 = vpop.f32.mrb[1].mxu0 }
 0x111   :  { %v3084_v16 = vadd.f32 %v2430_v12, %v159_v15 }
 0x112   :  { %413 = vrot.lane.b32.xlu1 %v3080_v14, %s2994_s2  ;;  %257 = vrot.lane.b32.xlu0 %v3080_v14, %s2995_s19 }
 0x116   :  { %411 = vrot.lane.b32.xlu1 %v3080_v14, %s2996_s20  ;;  %179 = vrot.lane.b32.xlu0 %v3084_v16, %s2995_s19 }
 0x11a   :  { %569 = vrot.lane.b32.xlu1 %v3080_v14, %s2997_s21  ;;  %333 = vrot.lane.b32.xlu0 %v3084_v16, %s2996_s20 }
 0x11e   :  { %335 = vrot.lane.b32.xlu1 %v3084_v16, %s2994_s2  ;;  %491 = vrot.lane.b32.xlu0 %v3084_v16, %s2997_s21 }
 0x122   :  { %567 = vrot.lane.b32.xlu1 %v3080_v14, %s2998_s22  ;;  %489 = vrot.lane.b32.xlu0 %v3084_v16, %s2998_s22 }
 0x126   :  { %725 = vrot.lane.b32.xlu1 %v3080_v14, %s2999_s23  ;;  %647 = vrot.lane.b32.xlu0 %v3084_v16, %s2999_s23 }
 0x12a   :  { %723 = vrot.lane.b32.xlu1 %v3080_v14, %s3000_s24  ;;  %645 = vrot.lane.b32.xlu0 %v3084_v16, %s3000_s24 }
 0x184   :  { %v414_v17 = vpop.permute.xlu1 %413  ;;  %v258_v18 = vpop.permute.xlu0 %257 }
 0x188   :  { %v412_v19 = vpop.permute.xlu1 %411  ;;  %v180_v20 = vpop.permute.xlu0 %179 }
 0x189   :  { %2580 = vmatpush3.xpose.msk.msra.mxu1 %vm181_vm2, %v180_v20 }
 0x18a   :  { %2584 = vmatprep.subr.mxu1 %v2992_v11 }
 0x18c   :  { %v570_v21 = vpop.permute.xlu1 %569  ;;  %2582 = vmatmul.mubr.msk.f32.vlgmr.msra.gmra.mrb[0].mxu1 %vm181_vm2, %v3084_v16  ;;  %v334_v22 = vpop.permute.xlu0 %333 }
 0x18d   :  { %2585 = vmatpush3.xpose.msk.msra.mxu1 %vm181_vm2, %v258_v18  ;;  %2586 = vmatprep.mubr.msk.f32.mxu1 %vm2993_vm1, %v2992_v11 }
 0x18e   :  { %2594 = vmatprep.subr.mxu1 %v2992_v11 }
 0x190   :  { %v336_v23 = vpop.permute.xlu1 %335  ;;  %2587 = vmatmul.mubr.msk.f32.vlgmr.msra.gmra.mrb[2].mxu1 %vm181_vm2, %v3080_v14  ;;  %v492_v24 = vpop.permute.xlu0 %491 }
 0x191   :  { %2590 = vmatpush3.xpose.msk.msra.mxu0 %vm181_vm2, %v336_v23  ;;  %2595 = vmatpush3.xpose.msk.msra.mxu1 %vm181_vm2, %v414_v17 }
 0x192   :  { %2596 = vmatprep.mubr.msk.f32.mxu1 %vm2993_vm1, %v2992_v11  ;;  %2599 = vmatprep.subr.mxu0 %v2992_v11 }
 0x193   :  { %2604 = vmatprep.subr.mxu1 %v2992_v11 }
 0x194   :  { %v568_v25 = vpop.permute.xlu1 %567  ;;  %2592 = vmatmul.mubr.msk.f32.vlgmr.msra.gmra.mrb[2].mxu0 %vm181_vm2, %v334_v22  ;;  %2597 = vmatmul.mubr.msk.f32.vlgmr.msra.gmra.mrb[4].mxu1 %vm181_vm2, %v412_v19  ;;  %v490_v26 = vpop.permute.xlu0 %489 }
 0x195   :  { %2600 = vmatpush3.xpose.msk.msra.mxu0 %vm181_vm2, %v492_v24  ;;  %2605 = vmatpush3.xpose.msk.msra.mxu1 %vm181_vm2, %v570_v21 }
 0x196   :  { %2601 = vmatprep.mubr.msk.f32.mxu0 %vm2993_vm1, %v2992_v11  ;;  %2606 = vmatprep.mubr.msk.f32.mxu1 %vm2993_vm1, %v2992_v11 }
 0x197   :  { %2609 = vmatprep.subr.mxu0 %v2992_v11  ;;  %2614 = vmatprep.subr.mxu1 %v2992_v11 }
 0x198   :  { %v726_v27 = vpop.permute.xlu1 %725  ;;  %2602 = vmatmul.mubr.msk.f32.vlgmr.msra.gmra.mrb[4].mxu0 %vm181_vm2, %v490_v26  ;;  %2607 = vmatmul.mubr.msk.f32.vlgmr.msra.gmra.mrb[6].mxu1 %vm181_vm2, %v568_v25  ;;  %v648_v28 = vpop.permute.xlu0 %647 }
 0x199   :  { %2610 = vmatpush3.xpose.msk.msra.mxu0 %vm181_vm2, %v648_v28  ;;  %2615 = vmatpush3.xpose.msk.msra.mxu1 %vm181_vm2, %v726_v27 }
 0x19a   :  { %2611 = vmatprep.mubr.msk.f32.mxu0 %vm2993_vm1, %v2992_v11  ;;  %2616 = vmatprep.mubr.msk.f32.mxu1 %vm2993_vm1, %v2992_v11 }
 0x19b   :  { %2619 = vmatprep.subr.mxu0 %v2992_v11  ;;  %2624 = vmatprep.subr.mxu1 %v2992_v11 }
 0x19c   :  { %v724_v29 = vpop.permute.xlu1 %723  ;;  %v646_v30 = vpop.permute.xlu0 %645 }
 0x19d   :  { %2612 = vmatmul.mubr.msk.f32.vlgmr.msra.gmra.mrb[6].mxu0 %vm181_vm2, %v646_v30  ;;  %2617 = vmatmul.mubr.msk.f32.vlgmr.msra.gmra.mrb[8].mxu1 %vm181_vm2, %v724_v29 }
 0x19e   :  { %2621 = vmatprep.mubr.msk.f32.mxu0 %vm2993_vm1, %v2992_v11  ;;  %2626 = vmatprep.mubr.msk.f32.mxu1 %vm2993_vm1, %v2992_v11 }
 0x25f   :  { %v252_v41 = vpop.f32.mrb[0].mxu1 }
 0x260   :  { %v809_v42 = vadd.f32 %v804_v39, %v252_v41  ;;  %v2583_v43 = vpop.f32.mrb[1].mxu1 }
 0x262   :  { %v817_v45 = vsel %vm181_vm2, %v809_v42, -inf }
 0x263   :  { %818 = vmax.xlane.f32.xlu0 %v817_v45  ;;  %v329_v46 = vpop.f32.mrb[2].mxu1 }
 0x264   :  { %v810_v47 = vadd.f32 %v808_v44, %v329_v46  ;;  %v2588_v48 = vpop.f32.mrb[3].mxu1 }
 0x266   :  { %v820_v49 = vsel %vm181_vm2, %v810_v47, -inf }
 0x267   :  { %821 = vmax.xlane.f32.xlu1 %v820_v49  ;;  %v407_v50 = vpop.f32.mrb[2].mxu0  ;;  %v485_v51 = vpop.f32.mrb[4].mxu1 }
 0x268   :  { %v811_v52 = vadd.f32 %v804_v39, %v407_v50  ;;  %v2593_v53 = vpop.f32.mrb[3].mxu0  ;;  %v2598_v54 = vpop.f32.mrb[5].mxu1  ;;  %v812_v55 = vadd.f32 %v808_v44, %v485_v51 }
 0x26a   :  { %v823_v56 = vsel %vm181_vm2, %v811_v52, -inf  ;;  %v826_v63 = vsel %vm181_vm2, %v812_v55, -inf }
 0x26b   :  { %v641_v57 = vpop.f32.mrb[6].mxu1  ;;  %824 = vmax.xlane.f32.xlu0 %v823_v56  ;;  %v563_v58 = vpop.f32.mrb[4].mxu0 }
 0x26c   :  { %v813_v59 = vadd.f32 %v804_v39, %v563_v58  ;;  %v2603_v60 = vpop.f32.mrb[5].mxu0  ;;  %v2608_v61 = vpop.f32.mrb[7].mxu1  ;;  %v814_v62 = vadd.f32 %v808_v44, %v641_v57 }
 0x26e   :  { %v829_v0 = vsel %vm181_vm2, %v813_v59, -inf  ;;  %v832_v7 = vsel %vm181_vm2, %v814_v62, -inf }
 0x26f   :  { %827 = vmax.xlane.f32.xlu0 %v826_v63  ;;  %830 = vmax.xlane.f32.xlu1 %v829_v0 }
 0x270   :  { %v719_v1 = vpop.f32.mrb[6].mxu0  ;;  %v797_v2 = vpop.f32.mrb[8].mxu1 }
 0x271   :  { %v815_v3 = vadd.f32 %v804_v39, %v719_v1  ;;  %v2613_v4 = vpop.f32.mrb[7].mxu0  ;;  %v2618_v5 = vpop.f32.mrb[9].mxu1  ;;  %v816_v6 = vadd.f32 %v808_v44, %v797_v2 }
 0x273   :  { %833 = vmax.xlane.f32.xlu0 %v832_v7  ;;  %v835_v9 = vsel %vm181_vm2, %v815_v3, -inf  ;;  %v838_v12 = vsel %vm181_vm2, %v816_v6, -inf }
 0x274   :  { %836 = vmax.xlane.f32.xlu1 %v835_v9 }
 0x277   :  { %839 = vmax.xlane.f32.xlu0 %v838_v12 }
 0x285   :  { %905 = vrot.lane.b32.xlu1 %v3084_v16, %s3002_s27 }
 0x289   :  { %1057 = vrot.lane.b32.xlu1 %v3084_v16, %s3003_s28 }
 0x28d   :  { %981 = vrot.lane.b32.xlu0 %v3080_v14, %s3002_s27  ;;  %1133 = vrot.lane.b32.xlu1 %v3080_v14, %s3003_s28 }
 0x291   :  { %1209 = vrot.lane.b32.xlu0 %v3084_v16, %s3004_s29  ;;  %1285 = vrot.lane.b32.xlu1 %v3080_v14, %s3004_s29 }
 0x2f0   :  { %v819_v13 = vpop.xlane.xlu0 %818 }
 0x2f1   :  { %v841_v15 = vsub.f32 %v809_v42, %v819_v13 }
 0x2f3   :  { %v849_v17 = vmul.f32 1.442695, %v841_v15 }
 0x2f4   :  { %v822_v18 = vpop.xlane.xlu1 %821 }
 0x2f5   :  { %2887 = vpow2.f32 %v849_v17  ;;  %v842_v19 = vsub.f32 %v810_v47, %v822_v18 }
 0x2f7   :  { %v851_v20 = vmul.f32 1.442695, %v842_v19 }
 0x2f8   :  { %v825_v21 = vpop.xlane.xlu0 %824 }
 0x2f9   :  { %2889 = vpow2.f32 %v851_v20  ;;  %v843_v22 = vsub.f32 %v811_v52, %v825_v21 }
 0x2fb   :  { %v853_v23 = vmul.f32 1.442695, %v843_v22 }
 0x2fc   :  { %v831_v24 = vpop.xlane.xlu1 %830  ;;  %v828_v25 = vpop.xlane.xlu0 %827 }
 0x2fd   :  { %2891 = vpow2.f32 %v853_v23  ;;  %v845_v26 = vsub.f32 %v813_v59, %v831_v24  ;;  %v844_v27 = vsub.f32 %v812_v55, %v828_v25 }
 0x2ff   :  { %v2888_v28 = vpop.eup %2887  ;;  %v857_v29 = vmul.f32 1.442695, %v845_v26  ;;  %v855_v30 = vmul.f32 1.442695, %v844_v27  ;;  %v48_v27 = vld [vmem:[#allocation6 + $0x20] sm:$0xff] }
 0x300   :  { %v834_v31 = vpop.xlane.xlu0 %833  ;;  %v865_v32 = vsel %vm181_vm2, %v2888_v28, 0.0 }
 0x301   :  { %2893 = vpow2.f32 %v857_v29  ;;  %v846_v33 = vsub.f32 %v814_v62, %v834_v31  ;;  %v837_v34 = vpop.xlane.xlu1 %836  ;;  %866 = vadd.xlane.f32.xlu1 %v865_v32  ;;  %v50_v32 = vld [vmem:[#allocation6 + $0x30] sm:$0xff] }
 0x302   :  { %2895 = vpow2.f32 %v855_v30  ;;  %v847_v35 = vsub.f32 %v815_v3, %v837_v34 }
 0x303   :  { %v2890_v36 = vpop.eup %2889  ;;  %v859_v37 = vmul.f32 1.442695, %v846_v33  ;;  %v51_v33 = vld [vmem:[#allocation6 + $0x38] sm:$0xff] }
 0x304   :  { %v861_v38 = vmul.f32 1.442695, %v847_v35  ;;  %v840_v39 = vpop.xlane.xlu0 %839  ;;  %v868_v40 = vsel %vm181_vm2, %v2890_v36, 0.0  ;;  %v2778_v35 = vpack.c.bf16 %v51_v33, %v50_v32  ;;  %v2462_v33 = vld [vmem:[#allocation6 + $0xc5] ss:$0 sm:$0xff] }
 0x305   :  { %2897 = vpow2.f32 %v859_v37  ;;  %v848_v41 = vsub.f32 %v816_v6, %v840_v39  ;;  %869 = vadd.xlane.f32.xlu0 %v868_v40  ;;  %v906_v42 = vpop.permute.xlu1 %905 }
 0x306   :  { %2899 = vpow2.f32 %v861_v38  ;;  %2620 = vmatpush3.msra.mxu0 %v906_v42 }
 0x307   :  { %v2892_v43 = vpop.eup %2891  ;;  %v863_v44 = vmul.f32 1.442695, %v848_v41  ;;  %2629 = vmatprep.subr.mxu0 %v2992_v11 }
 0x308   :  { %v982_v45 = vpop.permute.xlu0 %981  ;;  %v871_v46 = vsel %vm181_vm2, %v2892_v43, 0.0 }
 0x309   :  { %2901 = vpow2.f32 %v863_v44  ;;  %872 = vadd.xlane.f32.xlu1 %v871_v46  ;;  %2625 = vmatpush3.msra.mxu1 %v982_v45  ;;  %v1058_v57 = vpop.permute.xlu1 %1057 }
 0x30a   :  { %2634 = vmatprep.subr.mxu1 %v2992_v11 }
 0x30b   :  { %v2894_v47 = vpop.eup %2893 }
 0x30c   :  { %v2896_v48 = vpop.eup %2895  ;;  %v877_v49 = vsel %vm181_vm2, %v2894_v47, 0.0  ;;  %v1210_v60 = vpop.permute.xlu0 %1209 }
 0x30d   :  { %878 = vadd.xlane.f32.xlu1 %v877_v49  ;;  %v874_v50 = vsel %vm181_vm2, %v2896_v48, 0.0  ;;  %v1134_v58 = vpop.permute.xlu1 %1133 }
 0x30e   :  { %875 = vadd.xlane.f32.xlu0 %v874_v50 }
 0x30f   :  { %v2898_v51 = vpop.eup %2897 }
 0x310   :  { %v3161_v52 = vpop.eup %2899  ;;  %v880_v53 = vsel %vm181_vm2, %v2898_v51, 0.0 }
 0x311   :  { %v883_v54 = vsel %vm181_vm2, %v3161_v52, 0.0  ;;  %v1286_v59 = vpop.permute.xlu1 %1285 }
 0x312   :  { %881 = vadd.xlane.f32.xlu0 %v880_v53  ;;  %884 = vadd.xlane.f32.xlu1 %v883_v54 }
 0x313   :  { %v3166_v55 = vpop.eup %2901 }
 0x314   :  { %v886_v56 = vsel %vm181_vm2, %v3166_v55, 0.0 }
 0x316   :  { %887 = vadd.xlane.f32.xlu0 %v886_v56 }
 0x323   :  { %1437 = vrot.lane.b32.xlu1 %v3080_v14, %s3005_s30 }
 0x32c   :  { %1361 = vrot.lane.b32.xlu0 %v3084_v16, %s3005_s30 }
 0x38e   :  { %v867_v61 = vpop.xlane.xlu1 %866 }
 0x38f   :  { %2903 = vrcp.f32 %v867_v61 }
 0x392   :  { %v870_v62 = vpop.xlane.xlu0 %869 }
 0x393   :  { %2905 = vrcp.f32 %v870_v62 }
 0x396   :  { %v873_v63 = vpop.xlane.xlu1 %872 }
 0x397   :  { %2907 = vrcp.f32 %v873_v63 }
 0x399   :  { %v2904_v0 = vpop.eup %2903 }
 0x39a   :  { %v897_v1 = vmul.f32 %v2904_v0, %v2888_v28  ;;  %v879_v2 = vpop.xlane.xlu1 %878  ;;  %v49_v28 = vld [vmem:[#allocation6 + $0x28] sm:$0xff] }
 0x39b   :  { %2909 = vrcp.f32 %v879_v2  ;;  %v876_v3 = vpop.xlane.xlu0 %875  ;;  %v2774_v30 = vpack.c.bf16 %v49_v28, %v48_v27 }
 0x39c   :  { %2911 = vrcp.f32 %v876_v3  ;;  %2622 = vmatmul.mubr.msk.f32.vlgmr.msra.gmra.mrb[8].mxu0 %vm181_vm2, %v897_v1 }
 0x39d   :  { %v2906_v14 = vpop.eup %2905  ;;  %2630 = vmatpush3.msra.mxu0 %v1058_v57  ;;  %2631 = vmatprep.mubr.msk.f32.mxu0 %vm2993_vm1, %v2992_v11 }
 0x39e   :  { %v898_v16 = vmul.f32 %v2906_v14, %v2890_v36  ;;  %2639 = vmatprep.subr.mxu0 %v2992_v11 }
 0x39f   :  { %v882_v4 = vpop.xlane.xlu0 %881  ;;  %v885_v5 = vpop.xlane.xlu1 %884 }
 0x3a0   :  { %2913 = vrcp.f32 %v882_v4  ;;  %2627 = vmatmul.mubr.msk.f32.vlgmr.msra.gmra.mrb[10].mxu1 %vm181_vm2, %v898_v16 }
 0x3a1   :  { %v2908_v6 = vpop.eup %2907  ;;  %2915 = vrcp.f32 %v885_v5  ;;  %2635 = vmatpush3.msra.mxu1 %v1134_v58  ;;  %2636 = vmatprep.mubr.msk.f32.mxu1 %vm2993_vm1, %v2992_v11 }
 0x3a2   :  { %v899_v7 = vmul.f32 %v2908_v6, %v2892_v43  ;;  %2644 = vmatprep.subr.mxu1 %v2992_v11 }
 0x3a3   :  { %v888_v9 = vpop.xlane.xlu0 %887  ;;  %v1438_v23 = vpop.permute.xlu1 %1437 }
 0x3a4   :  { %2917 = vrcp.f32 %v888_v9  ;;  %2632 = vmatmul.mubr.msk.f32.vlgmr.msra.gmra.mrb[10].mxu0 %vm181_vm2, %v899_v7 }
 0x3a5   :  { %v2910_v12 = vpop.eup %2909  ;;  %2640 = vmatpush3.msra.mxu0 %v1210_v60  ;;  %2641 = vmatprep.mubr.msk.f32.mxu0 %vm2993_vm1, %v2992_v11 }
 0x3a6   :  { %v2912_v13 = vpop.eup %2911  ;;  %v901_v15 = vmul.f32 %v2910_v12, %v2894_v47  ;;  %2649 = vmatprep.subr.mxu0 %v2992_v11 }
 0x3a7   :  { %v900_v17 = vmul.f32 %v2912_v13, %v2896_v48  ;;  %v1362_v18 = vpop.permute.xlu0 %1361 }
 0x3a8   :  { %2642 = vmatmul.mubr.msk.f32.vlgmr.msra.gmra.mrb[12].mxu0 %vm181_vm2, %v901_v15  ;;  %v53_v15 = vld [vmem:[#allocation6 + $0x48] sm:$0xff] }
 0x3a9   :  { %2637 = vmatmul.mubr.msk.f32.vlgmr.msra.gmra.mrb[12].mxu1 %vm181_vm2, %v900_v17  ;;  %2650 = vmatpush3.msra.mxu0 %v1362_v18  ;;  %v54_v18 = vld [vmem:[#allocation6 + $0x50] sm:$0xff] }
 0x3aa   :  { %v2914_v19 = vpop.eup %2913  ;;  %2645 = vmatpush3.msra.mxu1 %v1286_v59  ;;  %2646 = vmatprep.mubr.msk.f32.mxu1 %vm2993_vm1, %v2992_v11  ;;  %v2458_v59 = vld [vmem:[#allocation6 + $0xc1] ss:$0 sm:$0xff] }
 0x3ab   :  { %v2916_v20 = vpop.eup %2915  ;;  %v902_v21 = vmul.f32 %v2914_v19, %v2898_v51  ;;  %2654 = vmatprep.subr.mxu1 %v2992_v11  ;;  %2651 = vmatprep.mubr.msk.f32.mxu0 %vm2993_vm1, %v2992_v11  ;;  %v55_v19 = vld [vmem:[#allocation6 + $0x58] sm:$0xff] }
 0x3ac   :  { %v903_v22 = vmul.f32 %v2916_v20, %v3161_v52  ;;  %2775 = vmatprep.subr.bf16.mxu0 %v2774_v30  ;;  %v2786_v20 = vpack.c.bf16 %v55_v19, %v54_v18  ;;  %v67_v18 = vld [vmem:[#allocation6 + $0xb8] sm:$0xff] }
 0x3ad   :  { %2647 = vmatmul.mubr.msk.f32.vlgmr.msra.gmra.mrb[14].mxu1 %vm181_vm2, %v902_v21  ;;  %v56_v21 = vld [vmem:[#allocation6 + $0x60] sm:$0xff] }
 0x3ae   :  { %v2918_v24 = vpop.eup %2917  ;;  %2655 = vmatpush3.msra.mxu1 %v1438_v23  ;;  %2652 = vmatmul.mubr.msk.f32.vlgmr.msra.gmra.mrb[14].mxu0 %vm181_vm2, %v903_v22  ;;  %v57_v22 = vld [vmem:[#allocation6 + $0x68] sm:$0xff] }
 0x3af   :  { %v904_v25 = vmul.f32 %v2918_v24, %v3166_v55  ;;  %2656 = vmatprep.mubr.msk.f32.mxu1 %vm2993_vm1, %v2992_v11  ;;  %2777 = vmatpush3.bf16.msra.mxu0 %v2774_v30  ;;  %v2790_v23 = vpack.c.bf16 %v57_v22, %v56_v21  ;;  %v1904_v22 = vand.u32 4294901760, %v67_v18 }
 0x3b0   :  { %2779 = vmatprep.subr.bf16.mxu0 %v2778_v35 }
 0x3b1   :  { %2657 = vmatmul.mubr.msk.f32.vlgmr.msra.gmra.mrb[16].mxu1 %vm181_vm2, %v904_v25 }
 0x3b3   :  { %2781 = vmatpush3.bf16.msra.mxu0 %v2778_v35 }
 0x46f   :  { %v977_v26 = vpop.f32.mrb[8].mxu0 }
 0x470   :  { %v2623_v29 = vpop.f32.mrb[9].mxu0 }
 0x473   :  { %v1053_v31 = vpop.f32.mrb[10].mxu1 }
 0x474   :  { %v2628_v34 = vpop.f32.mrb[11].mxu1 }
 0x477   :  { %v1129_v36 = vpop.f32.mrb[10].mxu0 }
 0x478   :  { %v2633_v37 = vpop.f32.mrb[11].mxu0  ;;  %1515 = vrot.lane.b32.xlu0 %v1129_v36, %s2990_s5 }
 0x47b   :  { %v1281_v11 = vpop.f32.mrb[12].mxu0 }
 0x47c   :  { %v1205_v38 = vpop.f32.mrb[12].mxu1  ;;  %1523 = vrot.lane.b32.xlu0 %v1281_v11, %s3006_s0  ;;  %v2643_v39 = vpop.f32.mrb[13].mxu0  ;;  %v58_v11 = vld [vmem:[#allocation6 + $0x70] sm:$0xff] }
 0x47d   :  { %1517 = vrot.lane.b32.xlu1 %v1205_v38, %s2990_s5  ;;  %v2638_v40 = vpop.f32.mrb[13].mxu1  ;;  %v59_v38 = vld [vmem:[#allocation6 + $0x78] sm:$0xff] }
 0x480   :  { %v1357_v41 = vpop.f32.mrb[14].mxu1 }
 0x481   :  { %1525 = vrot.lane.b32.xlu1 %v1357_v41, %s3006_s0  ;;  %v2648_v42 = vpop.f32.mrb[15].mxu1  ;;  %v1433_v43 = vpop.f32.mrb[14].mxu0  ;;  %v2794_v41 = vpack.c.bf16 %v59_v38, %v58_v11 }
 0x482   :  { %1531 = vrot.lane.b32.xlu0 %v1433_v43, %s3007_s4  ;;  %v2653_v44 = vpop.f32.mrb[15].mxu0  ;;  %v60_v42 = vld [vmem:[#allocation6 + $0x80] sm:$0xff]  ;;  %v61_v43 = vld [vmem:[#allocation6 + $0x88] sm:$0xff] }
 0x483   :  { %v2798_v44 = vpack.c.bf16 %v61_v43, %v60_v42 }
 0x484   :  { %v1509_v45 = vpop.f32.mrb[16].mxu1 }
 0x485   :  { %1533 = vrot.lane.b32.xlu1 %v1509_v45, %s3007_s4  ;;  %v2658_v46 = vpop.f32.mrb[17].mxu1  ;;  %v62_v45 = vld [vmem:[#allocation6 + $0x90] sm:$0xff] }
 0x486   :  { %v63_v46 = vld [vmem:[#allocation6 + $0x98] sm:$0xff] }
 0x4ea   :  { %v1516_v47 = vpop.permute.xlu0 %1515 }
 0x4eb   :  { %v1537_v50 = vsel %vm181_vm2, %v977_v26, %v1516_v47  ;;  %v2802_v47 = vpack.c.bf16 %v63_v46, %v62_v45 }
 0x4ee   :  { %v1524_v48 = vpop.permute.xlu0 %1523 }
 0x4ef   :  { %v1518_v49 = vpop.permute.xlu1 %1517  ;;  %v1540_v52 = vsel %vm1539_vm5, %v1537_v50, %v1524_v48  ;;  %v2463_v48 = vld [vmem:[#allocation6 + $0xc2] ss:$0 sm:$0xff] }
 0x4f0   :  { %v1538_v55 = vsel %vm181_vm2, %v1053_v31, %v1518_v49  ;;  %v2461_v31 = vld [vmem:[#allocation6 + $0xc4] ss:$0 sm:$0xff] }
 0x4f3   :  { %v1526_v51 = vpop.permute.xlu1 %1525 }
 0x4f4   :  { %v1532_v53 = vpop.permute.xlu0 %1531  ;;  %v1541_v56 = vsel %vm1539_vm5, %v1538_v55, %v1526_v51  ;;  %v2466_v55 = vld [vmem:[#allocation6 + $0xc3] ss:$0 sm:$0xff] }
 0x4f5   :  { %v1543_v54 = vsel %vm1542_vm6, %v1540_v52, %v1532_v53 }
 0x4f6   :  { %2667 = vmatprep.mubr.msk.f32.mxu0 %vm86_vm0, %v1543_v54 }
 0x4f7   :  { %v1534_v57 = vpop.permute.xlu1 %1533 }
 0x4f8   :  { %v1544_v58 = vsel %vm1542_vm6, %v1541_v56, %v1534_v57 }
 0x4f9   :  { %2668 = vmatmul.mubr.msk.f32.vlgmr.msra.gmra.mrb[16].mxu0 %vm86_vm0, %v1544_v58 }
 0x5cc   :  { %v2669_v60 = vpop.f32.mrb[16].mxu0 }
 0x5cd   :  { %v1627_v61 = vadd.f32 %v2669_v60, %v2458_v59  ;;  %v1621_v62 = vpop.f32.mrb[17].mxu0 }
 0x5ce   :  { %v1622_v63 = vadd.f32 %v2458_v59, %v1621_v62 }
 0x5cf   :  { %v1631_v0 = vadd.f32 %v1627_v61, %v3070_v10 }
 0x5d0   :  { %v1630_v1 = vadd.f32 %v1622_v63, %v3066_v8  ;;  %v52_v8 = vld [vmem:[#allocation6 + $0x40] sm:$0xff] }
 0x5d1   :  { %v1635_v2 = vsel %vm86_vm0, %v1631_v0, 0.0  ;;  %v2782_v17 = vpack.c.bf16 %v53_v15, %v52_v8 }
 0x5d2   :  { %1636 = vadd.xlane.f32.xlu1 %v1635_v2  ;;  %v1632_v3 = vsel %vm86_vm0, %v1630_v1, 0.0 }
 0x5d3   :  { %1633 = vadd.xlane.f32.xlu0 %v1632_v3  ;;  %2783 = vmatprep.subr.bf16.mxu0 %v2782_v17 }
 0x5d4   :  { %2785 = vmatpush3.bf16.msra.mxu0 %v2782_v17  ;;  %v66_v17 = vld [vmem:[#allocation6 + $0xb0] sm:$0xff] }
 0x5d5   :  { %2787 = vmatprep.subr.bf16.mxu0 %v2786_v20  ;;  %v1901_v21 = vand.u32 4294901760, %v66_v17 }
 0x5d8   :  { %2789 = vmatpush3.bf16.msra.mxu0 %v2786_v20 }
 0x5d9   :  { %2791 = vmatprep.subr.bf16.mxu0 %v2790_v23 }
 0x65f   :  { %v1637_v14 = vpop.xlane.xlu1 %1636 }
 0x660   :  { %v1640_v16 = vmul.f32 0.03125, %v1637_v14  ;;  %v1634_v4 = vpop.xlane.xlu0 %1633 }
 0x661   :  { %v1639_v5 = vmul.f32 0.03125, %v1634_v4 }
 0x662   :  { %v1642_v6 = vsub.f32 %v1631_v0, %v1640_v16 }
 0x663   :  { %v1641_v7 = vsub.f32 %v1630_v1, %v1639_v5 }
 0x664   :  { %v1644_v13 = vmul.f32 %v1642_v6, %v1642_v6 }
 0x665   :  { %v1643_v9 = vmul.f32 %v1641_v7, %v1641_v7 }
 0x666   :  { %v1648_v10 = vsel %vm86_vm0, %v1644_v13, 0.0 }
 0x667   :  { %v1645_v12 = vsel %vm86_vm0, %v1643_v9, 0.0  ;;  %v64_v9 = vld [vmem:[#allocation6 + $0xa0] sm:$0xff] }
 0x668   :  { %1646 = vadd.xlane.f32.xlu0 %v1645_v12  ;;  %v65_v12 = vld [vmem:[#allocation6 + $0xa8] sm:$0xff]  ;;  %v1895_v13 = vand.u32 4294901760, %v64_v9 }
 0x66a   :  { %v1985_v8 = vsub.f32 %v64_v9, %v1895_v13 }
 0x66c   :  { %1649 = vadd.xlane.f32.xlu0 %v1648_v10  ;;  %v1898_v10 = vand.u32 4294901760, %v65_v12  ;;  %v1986_v19 = vand.u32 4294901760, %v1985_v8 }
 0x66e   :  { %v1992_v15 = vsub.f32 %v65_v12, %v1898_v10 }
 0x670   :  { %v1993_v20 = vand.u32 4294901760, %v1992_v15  ;;  %v2822_v38 = vpack.c.bf16 %v1992_v15, %v1985_v8 }
 0x6f5   :  { %v1647_v24 = vpop.xlane.xlu0 %1646 }
 0x6f6   :  { %v1651_v25 = vmul.f32 0.03125, %v1647_v24  ;;  %v1994_v24 = vsub.f32 %v1992_v15, %v1993_v20 }
 0x6f8   :  { %v1653_v26 = vadd.f32 1e-05, %v1651_v25  ;;  %v1999_v25 = vsub.f32 %v66_v17, %v1901_v21 }
 0x6f9   :  { %v1650_v27 = vpop.xlane.xlu0 %1649 }
 0x6fa   :  { %2919 = vrsqrt.f32 %v1653_v26  ;;  %v1652_v28 = vmul.f32 0.03125, %v1650_v27  ;;  %v2006_v26 = vsub.f32 %v67_v18, %v1904_v22 }
 0x6fc   :  { %v1654_v29 = vadd.f32 1e-05, %v1652_v28  ;;  %v1995_v28 = vand.u32 4294901760, %v1994_v24 }
 0x6fe   :  { %2921 = vrsqrt.f32 %v1654_v29  ;;  %v2000_v29 = vand.u32 4294901760, %v1999_v25 }
 0x704   :  { %v2920_v30 = vpop.eup %2919 }
 0x705   :  { %v1657_v32 = vmul.f32 %v2920_v30, %v1641_v7  ;;  %v2007_v30 = vand.u32 4294901760, %v2006_v26 }
 0x707   :  { %v1663_v34 = vmul.f32 %v2461_v31, %v1657_v32  ;;  %v3218_v32 = vpack.c.bf16 %v1904_v22, %v1901_v21 }
 0x708   :  { %v2922_v35 = vpop.eup %2921 }
 0x709   :  { %v1658_v36 = vmul.f32 %v2922_v35, %v1642_v6  ;;  %v1669_v37 = vadd.f32 %v2462_v33, %v1663_v34  ;;  %v2001_v34 = vsub.f32 %v1999_v25, %v2000_v29  ;;  %v2008_v35 = vsub.f32 %v2006_v26, %v2007_v30 }
 0x70b   :  { %v1664_v39 = vmul.f32 %v2461_v31, %v1658_v36  ;;  %2678 = vmatprep.mubr.msk.f32.mxu0 %vm86_vm0, %v1669_v37  ;;  %v3216_v31 = vpack.c.bf16 %v1898_v10, %v1895_v13  ;;  %v2002_v36 = vand.u32 4294901760, %v2001_v34 }
 0x70d   :  { %v1670_v40 = vadd.f32 %v2462_v33, %v1664_v39  ;;  %v2826_v39 = vpack.c.bf16 %v2006_v26, %v1999_v25 }
 0x70f   :  { %2679 = vmatmul.mubr.msk.f32.vlgmr.msra.gmra.mrb[18].mxu0 %vm86_vm0, %v1670_v40 }
 0x710   :  { %2793 = vmatpush3.bf16.msra.mxu0 %v2790_v23  ;;  %v1987_v23 = vsub.f32 %v1985_v8, %v1986_v19 }
 0x711   :  { %2795 = vmatprep.subr.bf16.mxu0 %v2794_v41 }
 0x712   :  { %v1988_v27 = vand.u32 4294901760, %v1987_v23 }
 0x714   :  { %2797 = vmatpush3.bf16.msra.mxu0 %v2794_v41  ;;  %v2814_v33 = vpack.c.bf16 %v1995_v28, %v1988_v27  ;;  %v2842_v41 = vpack.c.bf16 %v2007_v30, %v2000_v29 }
 0x715   :  { %2799 = vmatprep.subr.bf16.mxu0 %v2798_v44 }
 0x716   :  { %2815 = vmatprep.subr.bf16.mxu1 %v2814_v33 }
 0x717   :  { %2817 = vmatpush3.bf16.msra.mxu1 %v2814_v33 }
 0x718   :  { %2801 = vmatpush3.bf16.msra.mxu0 %v2798_v44 }
 0x719   :  { %2803 = vmatprep.subr.bf16.mxu0 %v2802_v47 }
 0x71c   :  { %2805 = vmatpush3.bf16.msra.mxu0 %v2802_v47 }
 0x71d   :  { %2807 = vmatprep.subr.bf16.mxu0 %v3216_v31 }
 0x7e2   :  { %v2680_v49 = vpop.f32.mrb[18].mxu0 }
 0x7e3   :  { %v1753_v50 = vadd.f32 %v2680_v49, %v2463_v48  ;;  %v1747_v51 = vpop.f32.mrb[19].mxu0  ;;  %v2469_v49 = vld [vmem:[#allocation6 + $0xc6] ss:$0 sm:$0xff] }
 0x7e4   :  { %v1748_v52 = vadd.f32 %v2463_v48, %v1747_v51 }
 0x7e5   :  { %v1757_v54 = vmax.f32 %v1753_v50, 0.0 }
 0x7e6   :  { %v1756_v53 = vmax.f32 %v1748_v52, 0.0 }
 0x7e8   :  { %2697 = vmatprep.mubr.msk.f32.mxu0 %vm1762_vm7, %v1756_v53  ;;  %v2470_v53 = vld [vmem:[#allocation6 + $0xc7] ss:$0 sm:$0xff] }
 0x7e9   :  { %2698 = vmatmul.mubr.msk.f32.vlgmr.msra.gmra.mrb[20].mxu0 %vm1762_vm7, %v1757_v54 }
 0x7ea   :  { %2809 = vmatpush3.bf16.msra.mxu0 %v3216_v31 }
 0x7eb   :  { %2811 = vmatprep.subr.bf16.mxu0 %v3218_v32 }
 0x7ee   :  { %2813 = vmatpush3.bf16.msra.mxu0 %v3218_v32 }
 0x8bc   :  { %v2699_v56 = vpop.f32.mrb[20].mxu0 }
 0x8bd   :  { %v1841_v57 = vadd.f32 %v2699_v56, %v2466_v55  ;;  %v1835_v58 = vpop.f32.mrb[21].mxu0 }
 0x8be   :  { %v1836_v59 = vadd.f32 %v2466_v55, %v1835_v58 }
 0x8bf   :  { %v1845_v60 = vadd.f32 %v1841_v57, %v1670_v40  ;;  %v2838_v40 = vpack.c.bf16 %v1993_v20, %v1986_v19 }
 0x8c0   :  { %v1844_v61 = vadd.f32 %v1836_v59, %v1669_v37  ;;  %v2009_v37 = vand.u32 4294901760, %v2008_v35 }
 0x8c1   :  { %v1849_v62 = vsel %vm86_vm0, %v1845_v60, 0.0 }
 0x8c2   :  { %1850 = vadd.xlane.f32.xlu0 %v1849_v62  ;;  %v1846_v63 = vsel %vm86_vm0, %v1844_v61, 0.0  ;;  %v2818_v11 = vpack.c.bf16 %v2009_v37, %v2002_v36 }
 0x8c3   :  { %1847 = vadd.xlane.f32.xlu1 %v1846_v63 }
 0x8c4   :  { %2819 = vmatprep.subr.bf16.mxu1 %v2818_v11 }
 0x8c5   :  { %2821 = vmatpush3.bf16.msra.mxu1 %v2818_v11 }
 0x8c6   :  { %2823 = vmatprep.subr.bf16.mxu1 %v2822_v38 }
 0x94f   :  { %v1851_v0 = vpop.xlane.xlu0 %1850 }
 0x950   :  { %v1853_v1 = vmul.f32 0.03125, %v1851_v0  ;;  %v1848_v2 = vpop.xlane.xlu1 %1847 }
 0x951   :  { %v1852_v3 = vmul.f32 0.03125, %v1848_v2 }
 0x952   :  { %v1855_v14 = vsub.f32 %v1845_v60, %v1853_v1 }
 0x953   :  { %v1854_v16 = vsub.f32 %v1844_v61, %v1852_v3 }
 0x954   :  { %v1857_v4 = vmul.f32 %v1855_v14, %v1855_v14 }
 0x955   :  { %v1856_v5 = vmul.f32 %v1854_v16, %v1854_v16 }
 0x956   :  { %v1861_v6 = vsel %vm86_vm0, %v1857_v4, 0.0 }
 0x957   :  { %1862 = vadd.xlane.f32.xlu0 %v1861_v6  ;;  %v1858_v7 = vsel %vm86_vm0, %v1856_v5, 0.0  ;;  %v2471_v6 = vld [vmem:[#allocation6 + $0xc8] ss:$0 sm:$0xff] }
 0x958   :  { %1859 = vadd.xlane.f32.xlu1 %v1858_v7 }
 0x9e4   :  { %v1863_v42 = vpop.xlane.xlu0 %1862 }
 0x9e5   :  { %v1865_v43 = vmul.f32 0.03125, %v1863_v42  ;;  %v1860_v44 = vpop.xlane.xlu1 %1859 }
 0x9e6   :  { %v1864_v45 = vmul.f32 0.03125, %v1860_v44 }
 0x9e7   :  { %v1867_v46 = vadd.f32 1e-05, %v1865_v43 }
 0x9e8   :  { %v1866_v47 = vadd.f32 1e-05, %v1864_v45 }
 0x9e9   :  { %2923 = vrsqrt.f32 %v1867_v46 }
 0x9ea   :  { %2925 = vrsqrt.f32 %v1866_v47 }
 0x9f3   :  { %v2924_v48 = vpop.eup %2923 }
 0x9f4   :  { %v2926_v50 = vpop.eup %2925  ;;  %v1871_v51 = vmul.f32 %v2924_v48, %v1855_v14 }
 0x9f5   :  { %v1870_v52 = vmul.f32 %v2926_v50, %v1854_v16 }
 0x9f6   :  { %v1877_v54 = vmul.f32 %v2469_v49, %v1871_v51 }
 0x9f7   :  { %v1876_v55 = vmul.f32 %v2469_v49, %v1870_v52 }
 0x9f8   :  { %v1883_v56 = vadd.f32 %v2470_v53, %v1877_v54 }
 0x9f9   :  { %v1882_v57 = vadd.f32 %v2470_v53, %v1876_v55 }
 0x9fa   :  { %v1892_v58 = vsel %vm86_vm0, %v1883_v56, 0 }
 0x9fb   :  { %v1889_v59 = vsel %vm86_vm0, %v1882_v57, 0  ;;  %v1973_v60 = vand.u32 4294901760, %v1892_v58 }
 0x9fc   :  { %v1963_v61 = vand.u32 4294901760, %v1889_v59 }
 0x9fd   :  { %v1974_v62 = vsub.f32 %v1892_v58, %v1973_v60 }
 0x9fe   :  { %2719 = vmatprep.mubr.f32.mxu1 %v1963_v61  ;;  %v1964_v63 = vsub.f32 %v1889_v59, %v1963_v61 }
 0x9ff   :  { %2720 = vmatmul.mubr.f32.vlgmr.msra.gmra.mrb[18].mxu1 %v1973_v60  ;;  %v1975_v0 = vand.u32 4294901760, %v1974_v62 }
 0xa00   :  { %2825 = vmatpush3.bf16.msra.mxu1 %v2822_v38  ;;  %2730 = vmatprep.mubr.f32.mxu1 %v1964_v63  ;;  %v1965_v1 = vand.u32 4294901760, %v1964_v63 }
 0xa01   :  { %2827 = vmatprep.subr.bf16.mxu1 %v2826_v39  ;;  %v1976_v2 = vsub.f32 %v1974_v62, %v1975_v0 }
 0xa02   :  { %v1966_v3 = vsub.f32 %v1964_v63, %v1965_v1 }
 0xa03   :  { %v1977_v16 = vand.u32 4294901760, %v1976_v2 }
 0xa04   :  { %2829 = vmatpush3.bf16.msra.mxu1 %v2826_v39  ;;  %v1967_v14 = vand.u32 4294901760, %v1966_v3 }
 0xa05   :  { %2831 = vmatprep.subr.bf16.mxu1 %v3216_v31 }
 0xa06   :  { %2708 = vmatprep.mubr.f32.mxu0 %v1967_v14 }
 0xa07   :  { %2709 = vmatmul.mubr.f32.vlgmr.msra.gmra.mrb[22].mxu0 %v1977_v16  ;;  %2731 = vmatmul.mubr.f32.vlgmr.msra.gmra.mrb[18].mxu1 %v1974_v62 }
 0xa08   :  { %2833 = vmatpush3.bf16.msra.mxu1 %v3216_v31  ;;  %2741 = vmatprep.mubr.f32.mxu1 %v1965_v1 }
 0xa09   :  { %2835 = vmatprep.subr.bf16.mxu1 %v3218_v32 }
 0xa0c   :  { %2837 = vmatpush3.bf16.msra.mxu1 %v3218_v32 }
 0xa0d   :  { %2839 = vmatprep.subr.bf16.mxu1 %v2838_v40 }
 0xa0f   :  { %2742 = vmatmul.mubr.f32.vlgmr.msra.gmra.mrb[18].mxu1 %v1975_v0 }
 0xa10   :  { %2841 = vmatpush3.bf16.msra.mxu1 %v2838_v40  ;;  %2752 = vmatprep.mubr.f32.mxu1 %v1963_v61 }
 0xa11   :  { %2843 = vmatprep.subr.bf16.mxu1 %v2842_v41 }
 0xa14   :  { %2845 = vmatpush3.bf16.msra.mxu1 %v2842_v41 }
 0xa15   :  { %2847 = vmatprep.subr.bf16.mxu1 %v3216_v31 }
 0xa17   :  { %2753 = vmatmul.mubr.f32.vlgmr.msra.gmra.mrb[18].mxu1 %v1973_v60 }
 0xa18   :  { %2849 = vmatpush3.bf16.msra.mxu1 %v3216_v31  ;;  %2763 = vmatprep.mubr.f32.mxu1 %v1963_v61 }
 0xa19   :  { %2851 = vmatprep.subr.bf16.mxu1 %v3218_v32 }
 0xa1c   :  { %2853 = vmatpush3.bf16.msra.mxu1 %v3218_v32 }
 0xa1f   :  { %2764 = vmatmul.mubr.f32.vlgmr.msra.gmra.mrb[18].mxu1 %v1973_v60 }
 0xada   :  { %v2710_v4 = vpop.f32.mrb[22].mxu0 }
 0xadb   :  { %v1969_v5 = vpop.f32.mrb[23].mxu0  ;;  %v1980_v7 = vadd.f32 %v2710_v4, %v2471_v6 }
 0xadc   :  { %v1970_v9 = vadd.f32 %v2471_v6, %v1969_v5 }
 0xaf2   :  { %v2765_v12 = vpop.f32.mrb[18].mxu1 }
 0xaf3   :  { %v2855_v13 = vadd.f32 %v2765_v12, %v1980_v7  ;;  %v2412_v10 = vpop.f32.mrb[19].mxu1 }
 0xaf4   :  { %v2857_v8 = vadd.f32 %v2412_v10, %v1970_v9 }
 0xaf5   :  { %2423 = vst [vmem:[%s3243_s3 + $0x8] sm:$0xff] %v2855_v13 }
 0xaf6   :  { %2422 = vst [vmem:[%s3243_s3] sm:$0xff] %v2857_v8 }
 0xaf7   :  { %2428 = vsyncpa [#allocation5], 1 }
 0xaf8   :  { %2429 = vsyncpa [#allocation7], 1 }

</bundles_post_ra>
